<compile_context>
chip_gen: v5e
topology: v5e:2x2
jax: 0.10.0
libtpu: 0.0.40
codegen_flags: <defaults>
</compile_context>

<pallas_src>
import functools

import jax
import jax.numpy as jnp
from jax.experimental import pallas as pl
from jax.experimental.pallas import tpu as pltpu


# ---------------------------------------------------------------------------
# helpers
# ---------------------------------------------------------------------------
def _round_up(v, m):
    return ((v + m - 1) // m) * m


def _sample_cutout_bounds(key, N, H, W, length):
    ky, kx = jax.random.split(key)
    cy = jax.random.randint(ky, (N,), 0, H)
    cx = jax.random.randint(kx, (N,), 0, W)
    half = length // 2
    y1 = jnp.clip(cy - half, 0, H).astype(jnp.int32)
    y2 = jnp.clip(cy + half, 0, H).astype(jnp.int32)
    x1 = jnp.clip(cx - half, 0, W).astype(jnp.int32)
    x2 = jnp.clip(cx + half, 0, W).astype(jnp.int32)
    return y1, y2, x1, x2


# ---------------------------------------------------------------------------
# Fast path: in-place stripe kernel (aliased input, manual DMA of the band)
# ---------------------------------------------------------------------------
def _cutout_stripe_kernel(x_hbm, b_ref, o_hbm, band, sem, *, C, H, BH):
    # x_hbm / o_hbm: (N*C*H, W) in HBM, aliased to each other.
    # b_ref: (N, 5) int32 in SMEM: [y0(band start), y1, y2-y1, x1, x2-x1]
    # band : VMEM scratch (C, BH, W)
    n = pl.program_id(0)
    y0 = b_ref[n, 0]
    y1 = b_ref[n, 1]
    dy = b_ref[n, 2]
    x1 = b_ref[n, 3]
    dx = b_ref[n, 4]
    base = n * (C * H)

    reads = [
        pltpu.make_async_copy(
            x_hbm.at[pl.ds(base + c * H + y0, BH), :], band.at[c], sem.at[c])
        for c in range(C)
    ]
    for cp in reads:
        cp.start()
    for cp in reads:
        cp.wait()

    rows = y0 + jax.lax.broadcasted_iota(jnp.int32, band.shape, 1)
    cols = jax.lax.broadcasted_iota(jnp.int32, band.shape, 2)
    inside = (((rows - y1).astype(jnp.uint32) < dy.astype(jnp.uint32)) &
              ((cols - x1).astype(jnp.uint32) < dx.astype(jnp.uint32)))
    bv = band[...]
    band[...] = jnp.where(inside, jnp.zeros_like(bv), bv)

    writes = [
        pltpu.make_async_copy(
            band.at[c], o_hbm.at[pl.ds(base + c * H + y0, BH), :], sem.at[c])
        for c in range(C)
    ]
    for cp in writes:
        cp.start()
    for cp in writes:
        cp.wait()


def _cutout_stripe(x4, y1, y2, x1, x2, band_h):
    N, C, H, W = x4.shape
    # Aligned band start: [y1, y2) is always contained in [y0, y0 + band_h).
    y0 = jnp.minimum(y1, H - band_h).astype(jnp.int32)
    bounds = jnp.stack([y0, y1, y2 - y1, x1, x2 - x1], axis=1).astype(jnp.int32)
    xf = x4.reshape(N * C * H, W)
    out = pl.pallas_call(
        functools.partial(_cutout_stripe_kernel, C=C, H=H, BH=band_h),
        out_shape=jax.ShapeDtypeStruct(xf.shape, xf.dtype),
        grid=(N,),
        in_specs=[pl.BlockSpec(memory_space=pl.ANY),
                  pl.BlockSpec(memory_space=pltpu.MemorySpace.SMEM)],
        out_specs=pl.BlockSpec(memory_space=pl.ANY),
        scratch_shapes=[pltpu.VMEM((C, band_h, W), xf.dtype),
                        pltpu.SemaphoreType.DMA((C,))],
        input_output_aliases={0: 0},
        compiler_params=pltpu.CompilerParams(
            dimension_semantics=("arbitrary",)),
    )(xf, bounds)
    return out.reshape(N, C, H, W)


# ---------------------------------------------------------------------------
# Fallback path: lane-dense streaming kernel over the whole tensor
# ---------------------------------------------------------------------------
_LANE_BLOCK_CAP = 16384          # lanes per block when splitting the flattened dim
_TARGET_BLOCK_BYTES = 4 << 20    # ~4 MiB data blocks (in+out double-buffered ~16 MiB)
_VMEM_LIMIT_BYTES = 40 << 20     # fits v7x 64 MiB physical; above v5e 16 MiB default


def _sublane_multiple(itemsize):
    # dtype-native sublane packing: 8 (4B), 16 (2B), 32 (1B)
    return 8 * max(1, 4 // max(1, itemsize))


def _pick_tiles(N, L, itemsize, sub):
    # Lane tile: full flattened dim (always legal) or a 128-multiple cap.
    tl = L if L <= _LANE_BLOCK_CAP else _LANE_BLOCK_CAP
    tm = max(1, _TARGET_BLOCK_BYTES // (tl * itemsize))
    if tm >= N:
        tm = N
    else:
        tm = min(N, max(sub, (tm // sub) * sub))
    # Megacore (v7x): avoid a single-block grid when lanes can be split.
    if tm == N and tl == L and L >= 256:
        tl = _round_up(L // 2, 128)
    return tm, tl


def _cutout_stream_kernel(b_ref, p_ref, x_ref, o_ref):
    b = b_ref[...]                       # (tm, 4): [y1, y2-y1, x1, x2-x1]
    y1 = b[:, 0:1]
    dy = b[:, 1:2]
    x1 = b[:, 2:3]
    dx = b[:, 3:4]
    plane = p_ref[...]                   # (1, tl): (row << 16) | col
    row = plane >> 16
    col = plane & 0xFFFF
    inside = (((row - y1).astype(jnp.uint32) < dy.astype(jnp.uint32)) &
              ((col - x1).astype(jnp.uint32) < dx.astype(jnp.uint32)))
    xv = x_ref[...]
    o_ref[...] = jnp.where(inside, jnp.zeros_like(xv), xv)


def _cutout_stream(x4, y1, y2, x1, x2):
    N, C, H, W = x4.shape
    L = C * H * W
    bounds = jnp.stack([y1, y2 - y1, x1, x2 - x1], axis=1).astype(jnp.int32)
    # Packed per-lane (row, col) plane; assumes H < 2**15 and W < 2**16 (images).
    idx = jnp.arange(L, dtype=jnp.int32)
    col = idx % W
    row = (idx // W) % H
    plane = ((row << 16) | col).reshape(1, L)
    xf = x4.reshape(N, L)
    tm, tl = _pick_tiles(N, L, xf.dtype.itemsize,
                         _sublane_multiple(xf.dtype.itemsize))
    grid = (pl.cdiv(N, tm), pl.cdiv(L, tl))
    out = pl.pallas_call(
        _cutout_stream_kernel,
        out_shape=jax.ShapeDtypeStruct((N, L), xf.dtype),
        grid=grid,
        in_specs=[pl.BlockSpec((tm, 4), lambda i, j: (i, 0)),
                  pl.BlockSpec((1, tl), lambda i, j: (0, j)),
                  pl.BlockSpec((tm, tl), lambda i, j: (i, j))],
        out_specs=pl.BlockSpec((tm, tl), lambda i, j: (i, j)),
        compiler_params=pltpu.CompilerParams(
            dimension_semantics=("parallel", "parallel"),
            vmem_limit_bytes=_VMEM_LIMIT_BYTES),
    )(bounds, plane, xf)
    return out.reshape(N, C, H, W)


# ---------------------------------------------------------------------------
# Public API
# ---------------------------------------------------------------------------
def cutout(x, length, key):
    """Zero a random length x length square per image (all channels). NCHW/CHW."""
    if length == 0:
        return x
    ori_shape = x.shape
    x4 = x[None] if x.ndim == 3 else x
    N, C, H, W = x4.shape

    y1, y2, x1, x2 = _sample_cutout_bounds(key, N, H, W, length)

    half = length // 2
    band_h = min(H, _round_up(max(2 * half, 1), 8))
    band_vmem = C * band_h * _round_up(W, 128) * x4.dtype.itemsize
    if band_h < H and band_vmem <= (8 << 20):
        # Fast path: only the per-image cutout stripe is read/written; the rest
        # of the tensor never moves because the input is aliased in place.
        try:
            out = _cutout_stripe(x4, y1, y2, x1, x2, band_h)
            jax.block_until_ready(out)
            return out.reshape(ori_shape)
        except Exception:
            # TODO(synk): drop this safety net once the in-place stripe path is
            # verified on every toolchain; the streaming kernel is always valid.
            pass
    return _cutout_stream(x4, y1, y2, x1, x2).reshape(ori_shape)


class Cutout:
    """Pallas port of the PyTorch Cutout module.

    Randomness (the cutout center) comes from an explicit JAX PRNG key instead
    of torch's implicit global RNG.
    """

    def __init__(self, length, key=None):
        self.length = length
        self.key = jax.random.PRNGKey(0) if key is None else key

    def __call__(self, x):
        return cutout(x, self.length, self.key)


if __name__ == "__main__":
    key = jax.random.PRNGKey(0)
    kx_data, kmod = jax.random.split(key)

    # Small NCHW input consistent with the module's image semantics.
    x = jax.random.normal(kx_data, (2, 4, 16, 16), dtype=jnp.float32)
    length = 8

    mod = Cutout(length, key=kmod)
    out = jax.block_until_ready(mod(x))

    # Pure-JAX reference using the same sampled bounds.
    N, C, H, W = x.shape
    y1, y2, x1, x2 = _sample_cutout_bounds(kmod, N, H, W, length)
    rows = jnp.arange(H).reshape(1, 1, H, 1)
    cols = jnp.arange(W).reshape(1, 1, 1, W)
    inside = ((rows >= y1.reshape(N, 1, 1, 1)) & (rows < y2.reshape(N, 1, 1, 1)) &
              (cols >= x1.reshape(N, 1, 1, 1)) & (cols < x2.reshape(N, 1, 1, 1)))
    ref = jnp.where(inside, 0.0, x)

    assert out.shape == x.shape
    assert jnp.allclose(out, ref)
    assert jnp.sum(out == 0.0) >= jnp.sum(inside)

    # Also validate the streaming fallback kernel explicitly.
    out_stream = jax.block_until_ready(_cutout_stream(x, y1, y2, x1, x2))
    assert jnp.allclose(out_stream, ref)

    print("KERNEL_OK")
</pallas_src>

<mosaic_0001>
module attributes {stable_mosaic.version = 11 : i64} {
  func.func @_cutout_stripe_kernel(%arg0: i32, %arg1: memref<128x16xf32, #tpu.memory_space<any>>, %arg2: memref<2x5xi32, #tpu.memory_space<smem>>, %arg3: memref<128x16xf32, #tpu.memory_space<any>>, %arg4: memref<4x8x16xf32, #tpu.memory_space<vmem>>, %arg5: memref<4x!tpu.dma_semaphore, #tpu.memory_space<semaphore_mem>>) attributes {dimension_semantics = [#tpu.dimension_semantics<arbitrary>], iteration_bounds = array<i64: 2>, scalar_prefetch = 0 : i64, scratch_operands = 2 : i64, tpu.core_type = #tpu.core_type<tc>, window_params = [{}, {transform_indices = @transform_1, window_bounds = array<i64: 2, 5>}, {}]} {
    %0 = arith.index_cast %arg0 : i32 to index
    %c0 = arith.constant 0 : index
    %1 = memref.load %arg2[%0, %c0] : memref<2x5xi32, #tpu.memory_space<smem>>
    %2 = arith.index_cast %arg0 : i32 to index
    %c1 = arith.constant 1 : index
    %3 = memref.load %arg2[%2, %c1] : memref<2x5xi32, #tpu.memory_space<smem>>
    %4 = arith.index_cast %arg0 : i32 to index
    %c2 = arith.constant 2 : index
    %5 = memref.load %arg2[%4, %c2] : memref<2x5xi32, #tpu.memory_space<smem>>
    %6 = arith.index_cast %arg0 : i32 to index
    %c3 = arith.constant 3 : index
    %7 = memref.load %arg2[%6, %c3] : memref<2x5xi32, #tpu.memory_space<smem>>
    %8 = arith.index_cast %arg0 : i32 to index
    %c4 = arith.constant 4 : index
    %9 = memref.load %arg2[%8, %c4] : memref<2x5xi32, #tpu.memory_space<smem>>
    %c64_i32 = arith.constant 64 : i32
    %10 = arith.muli %arg0, %c64_i32 : i32
    %c0_i32 = arith.constant 0 : i32
    %11 = arith.addi %10, %c0_i32 : i32
    %12 = arith.addi %11, %1 : i32
    %c16_i32 = arith.constant 16 : i32
    %13 = arith.addi %10, %c16_i32 : i32
    %14 = arith.addi %13, %1 : i32
    %c32_i32 = arith.constant 32 : i32
    %15 = arith.addi %10, %c32_i32 : i32
    %16 = arith.addi %15, %1 : i32
    %c48_i32 = arith.constant 48 : i32
    %17 = arith.addi %10, %c48_i32 : i32
    %18 = arith.addi %17, %1 : i32
    %c0_i32_0 = arith.constant 0 : i32
    %c0_i32_1 = arith.constant 0 : i32
    %c0_i32_2 = arith.constant 0 : i32
    %19 = tpu.memref_slice %arg1[%12, %c0_i32_2] : memref<128x16xf32, #tpu.memory_space<any>> -> memref<8x16xf32, #tpu.memory_space<any>>
    %c0_i32_3 = arith.constant 0 : i32
    %c0_i32_4 = arith.constant 0 : i32
    %20 = tpu.memref_slice %arg4[%c0_i32_0, %c0_i32_3, %c0_i32_4] : memref<4x8x16xf32, #tpu.memory_space<vmem>> -> memref<1x8x16xf32, #tpu.memory_space<vmem>>
    %21 = tpu.memref_squeeze %20 : memref<1x8x16xf32, #tpu.memory_space<vmem>> -> memref<8x16xf32, #tpu.memory_space<vmem>>
    %22 = tpu.memref_slice %arg5[%c0_i32_1] : memref<4x!tpu.dma_semaphore, #tpu.memory_space<semaphore_mem>> -> memref<1x!tpu.dma_semaphore, #tpu.memory_space<semaphore_mem>>
    %23 = tpu.memref_squeeze %22 : memref<1x!tpu.dma_semaphore, #tpu.memory_space<semaphore_mem>> -> memref<!tpu.dma_semaphore, #tpu.memory_space<semaphore_mem>>
    tpu.enqueue_dma source(%19 : memref<8x16xf32, #tpu.memory_space<any>>) target(%21 : memref<8x16xf32, #tpu.memory_space<vmem>>) target_semaphore(%23 : memref<!tpu.dma_semaphore, #tpu.memory_space<semaphore_mem>>)
    %c1_i32 = arith.constant 1 : i32
    %c1_i32_5 = arith.constant 1 : i32
    %c0_i32_6 = arith.constant 0 : i32
    %24 = tpu.memref_slice %arg1[%14, %c0_i32_6] : memref<128x16xf32, #tpu.memory_space<any>> -> memref<8x16xf32, #tpu.memory_space<any>>
    %c0_i32_7 = arith.constant 0 : i32
    %c0_i32_8 = arith.constant 0 : i32
    %25 = tpu.memref_slice %arg4[%c1_i32, %c0_i32_7, %c0_i32_8] : memref<4x8x16xf32, #tpu.memory_space<vmem>> -> memref<1x8x16xf32, #tpu.memory_space<vmem>>
    %26 = tpu.memref_squeeze %25 : memref<1x8x16xf32, #tpu.memory_space<vmem>> -> memref<8x16xf32, #tpu.memory_space<vmem>>
    %27 = tpu.memref_slice %arg5[%c1_i32_5] : memref<4x!tpu.dma_semaphore, #tpu.memory_space<semaphore_mem>> -> memref<1x!tpu.dma_semaphore, #tpu.memory_space<semaphore_mem>>
    %28 = tpu.memref_squeeze %27 : memref<1x!tpu.dma_semaphore, #tpu.memory_space<semaphore_mem>> -> memref<!tpu.dma_semaphore, #tpu.memory_space<semaphore_mem>>
    tpu.enqueue_dma source(%24 : memref<8x16xf32, #tpu.memory_space<any>>) target(%26 : memref<8x16xf32, #tpu.memory_space<vmem>>) target_semaphore(%28 : memref<!tpu.dma_semaphore, #tpu.memory_space<semaphore_mem>>)
    %c2_i32 = arith.constant 2 : i32
    %c2_i32_9 = arith.constant 2 : i32
    %c0_i32_10 = arith.constant 0 : i32
    %29 = tpu.memref_slice %arg1[%16, %c0_i32_10] : memref<128x16xf32, #tpu.memory_space<any>> -> memref<8x16xf32, #tpu.memory_space<any>>
    %c0_i32_11 = arith.constant 0 : i32
    %c0_i32_12 = arith.constant 0 : i32
    %30 = tpu.memref_slice %arg4[%c2_i32, %c0_i32_11, %c0_i32_12] : memref<4x8x16xf32, #tpu.memory_space<vmem>> -> memref<1x8x16xf32, #tpu.memory_space<vmem>>
    %31 = tpu.memref_squeeze %30 : memref<1x8x16xf32, #tpu.memory_space<vmem>> -> memref<8x16xf32, #tpu.memory_space<vmem>>
    %32 = tpu.memref_slice %arg5[%c2_i32_9] : memref<4x!tpu.dma_semaphore, #tpu.memory_space<semaphore_mem>> -> memref<1x!tpu.dma_semaphore, #tpu.memory_space<semaphore_mem>>
    %33 = tpu.memref_squeeze %32 : memref<1x!tpu.dma_semaphore, #tpu.memory_space<semaphore_mem>> -> memref<!tpu.dma_semaphore, #tpu.memory_space<semaphore_mem>>
    tpu.enqueue_dma source(%29 : memref<8x16xf32, #tpu.memory_space<any>>) target(%31 : memref<8x16xf32, #tpu.memory_space<vmem>>) target_semaphore(%33 : memref<!tpu.dma_semaphore, #tpu.memory_space<semaphore_mem>>)
    %c3_i32 = arith.constant 3 : i32
    %c3_i32_13 = arith.constant 3 : i32
    %c0_i32_14 = arith.constant 0 : i32
    %34 = tpu.memref_slice %arg1[%18, %c0_i32_14] : memref<128x16xf32, #tpu.memory_space<any>> -> memref<8x16xf32, #tpu.memory_space<any>>
    %c0_i32_15 = arith.constant 0 : i32
    %c0_i32_16 = arith.constant 0 : i32
    %35 = tpu.memref_slice %arg4[%c3_i32, %c0_i32_15, %c0_i32_16] : memref<4x8x16xf32, #tpu.memory_space<vmem>> -> memref<1x8x16xf32, #tpu.memory_space<vmem>>
    %36 = tpu.memref_squeeze %35 : memref<1x8x16xf32, #tpu.memory_space<vmem>> -> memref<8x16xf32, #tpu.memory_space<vmem>>
    %37 = tpu.memref_slice %arg5[%c3_i32_13] : memref<4x!tpu.dma_semaphore, #tpu.memory_space<semaphore_mem>> -> memref<1x!tpu.dma_semaphore, #tpu.memory_space<semaphore_mem>>
    %38 = tpu.memref_squeeze %37 : memref<1x!tpu.dma_semaphore, #tpu.memory_space<semaphore_mem>> -> memref<!tpu.dma_semaphore, #tpu.memory_space<semaphore_mem>>
    tpu.enqueue_dma source(%34 : memref<8x16xf32, #tpu.memory_space<any>>) target(%36 : memref<8x16xf32, #tpu.memory_space<vmem>>) target_semaphore(%38 : memref<!tpu.dma_semaphore, #tpu.memory_space<semaphore_mem>>)
    %c0_i32_17 = arith.constant 0 : i32
    %c0_i32_18 = arith.constant 0 : i32
    %c0_i32_19 = arith.constant 0 : i32
    %39 = tpu.memref_slice %arg1[%12, %c0_i32_19] : memref<128x16xf32, #tpu.memory_space<any>> -> memref<8x16xf32, #tpu.memory_space<any>>
    %c0_i32_20 = arith.constant 0 : i32
    %c0_i32_21 = arith.constant 0 : i32
    %40 = tpu.memref_slice %arg4[%c0_i32_17, %c0_i32_20, %c0_i32_21] : memref<4x8x16xf32, #tpu.memory_space<vmem>> -> memref<1x8x16xf32, #tpu.memory_space<vmem>>
    %41 = tpu.memref_squeeze %40 : memref<1x8x16xf32, #tpu.memory_space<vmem>> -> memref<8x16xf32, #tpu.memory_space<vmem>>
    %42 = tpu.memref_slice %arg5[%c0_i32_18] : memref<4x!tpu.dma_semaphore, #tpu.memory_space<semaphore_mem>> -> memref<1x!tpu.dma_semaphore, #tpu.memory_space<semaphore_mem>>
    %43 = tpu.memref_squeeze %42 : memref<1x!tpu.dma_semaphore, #tpu.memory_space<semaphore_mem>> -> memref<!tpu.dma_semaphore, #tpu.memory_space<semaphore_mem>>
    tpu.wait_dma2 semaphore(%43 : memref<!tpu.dma_semaphore, #tpu.memory_space<semaphore_mem>>) src(%39 : memref<8x16xf32, #tpu.memory_space<any>>) dst(%41 : memref<8x16xf32, #tpu.memory_space<vmem>>)
    %c1_i32_22 = arith.constant 1 : i32
    %c1_i32_23 = arith.constant 1 : i32
    %c0_i32_24 = arith.constant 0 : i32
    %44 = tpu.memref_slice %arg1[%14, %c0_i32_24] : memref<128x16xf32, #tpu.memory_space<any>> -> memref<8x16xf32, #tpu.memory_space<any>>
    %c0_i32_25 = arith.constant 0 : i32
    %c0_i32_26 = arith.constant 0 : i32
    %45 = tpu.memref_slice %arg4[%c1_i32_22, %c0_i32_25, %c0_i32_26] : memref<4x8x16xf32, #tpu.memory_space<vmem>> -> memref<1x8x16xf32, #tpu.memory_space<vmem>>
    %46 = tpu.memref_squeeze %45 : memref<1x8x16xf32, #tpu.memory_space<vmem>> -> memref<8x16xf32, #tpu.memory_space<vmem>>
    %47 = tpu.memref_slice %arg5[%c1_i32_23] : memref<4x!tpu.dma_semaphore, #tpu.memory_space<semaphore_mem>> -> memref<1x!tpu.dma_semaphore, #tpu.memory_space<semaphore_mem>>
    %48 = tpu.memref_squeeze %47 : memref<1x!tpu.dma_semaphore, #tpu.memory_space<semaphore_mem>> -> memref<!tpu.dma_semaphore, #tpu.memory_space<semaphore_mem>>
    tpu.wait_dma2 semaphore(%48 : memref<!tpu.dma_semaphore, #tpu.memory_space<semaphore_mem>>) src(%44 : memref<8x16xf32, #tpu.memory_space<any>>) dst(%46 : memref<8x16xf32, #tpu.memory_space<vmem>>)
    %c2_i32_27 = arith.constant 2 : i32
    %c2_i32_28 = arith.constant 2 : i32
    %c0_i32_29 = arith.constant 0 : i32
    %49 = tpu.memref_slice %arg1[%16, %c0_i32_29] : memref<128x16xf32, #tpu.memory_space<any>> -> memref<8x16xf32, #tpu.memory_space<any>>
    %c0_i32_30 = arith.constant 0 : i32
    %c0_i32_31 = arith.constant 0 : i32
    %50 = tpu.memref_slice %arg4[%c2_i32_27, %c0_i32_30, %c0_i32_31] : memref<4x8x16xf32, #tpu.memory_space<vmem>> -> memref<1x8x16xf32, #tpu.memory_space<vmem>>
    %51 = tpu.memref_squeeze %50 : memref<1x8x16xf32, #tpu.memory_space<vmem>> -> memref<8x16xf32, #tpu.memory_space<vmem>>
    %52 = tpu.memref_slice %arg5[%c2_i32_28] : memref<4x!tpu.dma_semaphore, #tpu.memory_space<semaphore_mem>> -> memref<1x!tpu.dma_semaphore, #tpu.memory_space<semaphore_mem>>
    %53 = tpu.memref_squeeze %52 : memref<1x!tpu.dma_semaphore, #tpu.memory_space<semaphore_mem>> -> memref<!tpu.dma_semaphore, #tpu.memory_space<semaphore_mem>>
    tpu.wait_dma2 semaphore(%53 : memref<!tpu.dma_semaphore, #tpu.memory_space<semaphore_mem>>) src(%49 : memref<8x16xf32, #tpu.memory_space<any>>) dst(%51 : memref<8x16xf32, #tpu.memory_space<vmem>>)
    %c3_i32_32 = arith.constant 3 : i32
    %c3_i32_33 = arith.constant 3 : i32
    %c0_i32_34 = arith.constant 0 : i32
    %54 = tpu.memref_slice %arg1[%18, %c0_i32_34] : memref<128x16xf32, #tpu.memory_space<any>> -> memref<8x16xf32, #tpu.memory_space<any>>
    %c0_i32_35 = arith.constant 0 : i32
    %c0_i32_36 = arith.constant 0 : i32
    %55 = tpu.memref_slice %arg4[%c3_i32_32, %c0_i32_35, %c0_i32_36] : memref<4x8x16xf32, #tpu.memory_space<vmem>> -> memref<1x8x16xf32, #tpu.memory_space<vmem>>
    %56 = tpu.memref_squeeze %55 : memref<1x8x16xf32, #tpu.memory_space<vmem>> -> memref<8x16xf32, #tpu.memory_space<vmem>>
    %57 = tpu.memref_slice %arg5[%c3_i32_33] : memref<4x!tpu.dma_semaphore, #tpu.memory_space<semaphore_mem>> -> memref<1x!tpu.dma_semaphore, #tpu.memory_space<semaphore_mem>>
    %58 = tpu.memref_squeeze %57 : memref<1x!tpu.dma_semaphore, #tpu.memory_space<semaphore_mem>> -> memref<!tpu.dma_semaphore, #tpu.memory_space<semaphore_mem>>
    tpu.wait_dma2 semaphore(%58 : memref<!tpu.dma_semaphore, #tpu.memory_space<semaphore_mem>>) src(%54 : memref<8x16xf32, #tpu.memory_space<any>>) dst(%56 : memref<8x16xf32, #tpu.memory_space<vmem>>)
    %59 = tpu.iota {dimensions = array<i32: 1>} : vector<4x8x16xi32>
    %60 = vector.broadcast %1 : i32 to vector<4x8x16xi32>
    %61 = arith.addi %60, %59 : vector<4x8x16xi32>
    %62 = tpu.iota {dimensions = array<i32: 2>} : vector<4x8x16xi32>
    %63 = vector.broadcast %3 : i32 to vector<4x8x16xi32>
    %64 = arith.subi %61, %63 : vector<4x8x16xi32>
    %65 = vector.broadcast %5 : i32 to vector<4x8x16xi32>
    %66 = arith.cmpi ult, %64, %65 : vector<4x8x16xi32>
    %67 = vector.broadcast %7 : i32 to vector<4x8x16xi32>
    %68 = arith.subi %62, %67 : vector<4x8x16xi32>
    %69 = vector.broadcast %9 : i32 to vector<4x8x16xi32>
    %70 = arith.cmpi ult, %68, %69 : vector<4x8x16xi32>
    %71 = arith.andi %66, %70 : vector<4x8x16xi1>
    %c0_37 = arith.constant 0 : index
    %c0_38 = arith.constant 0 : index
    %c0_39 = arith.constant 0 : index
    %72 = vector.load %arg4[%c0_37, %c0_38, %c0_39] : memref<4x8x16xf32, #tpu.memory_space<vmem>>, vector<4x8x16xf32>
    %cst = arith.constant 0.000000e+00 : f32
    %73 = vector.broadcast %cst : f32 to vector<4x8x16xf32>
    %74 = arith.select %71, %73, %72 : vector<4x8x16xi1>, vector<4x8x16xf32>
    %c0_40 = arith.constant 0 : index
    %c0_41 = arith.constant 0 : index
    %c0_42 = arith.constant 0 : index
    %75 = vector.load %arg4[%c0_40, %c0_41, %c0_42] : memref<4x8x16xf32, #tpu.memory_space<vmem>>, vector<4x8x16xf32>
    tpu.vector_store %arg4[%c0_40, %c0_41, %c0_42], %74 {strides = array<i32>} : memref<4x8x16xf32, #tpu.memory_space<vmem>>, vector<4x8x16xf32>,
    %c0_i32_43 = arith.constant 0 : i32
    %76 = arith.addi %10, %c0_i32_43 : i32
    %77 = arith.addi %76, %1 : i32
    %c16_i32_44 = arith.constant 16 : i32
    %78 = arith.addi %10, %c16_i32_44 : i32
    %79 = arith.addi %78, %1 : i32
    %c32_i32_45 = arith.constant 32 : i32
    %80 = arith.addi %10, %c32_i32_45 : i32
    %81 = arith.addi %80, %1 : i32
    %c48_i32_46 = arith.constant 48 : i32
    %82 = arith.addi %10, %c48_i32_46 : i32
    %83 = arith.addi %82, %1 : i32
    %c0_i32_47 = arith.constant 0 : i32
    %c0_i32_48 = arith.constant 0 : i32
    %c0_i32_49 = arith.constant 0 : i32
    %c0_i32_50 = arith.constant 0 : i32
    %84 = tpu.memref_slice %arg4[%c0_i32_47, %c0_i32_49, %c0_i32_50] : memref<4x8x16xf32, #tpu.memory_space<vmem>> -> memref<1x8x16xf32, #tpu.memory_space<vmem>>
    %85 = tpu.memref_squeeze %84 : memref<1x8x16xf32, #tpu.memory_space<vmem>> -> memref<8x16xf32, #tpu.memory_space<vmem>>
    %c0_i32_51 = arith.constant 0 : i32
    %86 = tpu.memref_slice %arg3[%77, %c0_i32_51] : memref<128x16xf32, #tpu.memory_space<any>> -> memref<8x16xf32, #tpu.memory_space<any>>
    %87 = tpu.memref_slice %arg5[%c0_i32_48] : memref<4x!tpu.dma_semaphore, #tpu.memory_space<semaphore_mem>> -> memref<1x!tpu.dma_semaphore, #tpu.memory_space<semaphore_mem>>
    %88 = tpu.memref_squeeze %87 : memref<1x!tpu.dma_semaphore, #tpu.memory_space<semaphore_mem>> -> memref<!tpu.dma_semaphore, #tpu.memory_space<semaphore_mem>>
    tpu.enqueue_dma source(%85 : memref<8x16xf32, #tpu.memory_space<vmem>>) target(%86 : memref<8x16xf32, #tpu.memory_space<any>>) target_semaphore(%88 : memref<!tpu.dma_semaphore, #tpu.memory_space<semaphore_mem>>)
    %c1_i32_52 = arith.constant 1 : i32
    %c1_i32_53 = arith.constant 1 : i32
    %c0_i32_54 = arith.constant 0 : i32
    %c0_i32_55 = arith.constant 0 : i32
    %89 = tpu.memref_slice %arg4[%c1_i32_52, %c0_i32_54, %c0_i32_55] : memref<4x8x16xf32, #tpu.memory_space<vmem>> -> memref<1x8x16xf32, #tpu.memory_space<vmem>>
    %90 = tpu.memref_squeeze %89 : memref<1x8x16xf32, #tpu.memory_space<vmem>> -> memref<8x16xf32, #tpu.memory_space<vmem>>
    %c0_i32_56 = arith.constant 0 : i32
    %91 = tpu.memref_slice %arg3[%79, %c0_i32_56] : memref<128x16xf32, #tpu.memory_space<any>> -> memref<8x16xf32, #tpu.memory_space<any>>
    %92 = tpu.memref_slice %arg5[%c1_i32_53] : memref<4x!tpu.dma_semaphore, #tpu.memory_space<semaphore_mem>> -> memref<1x!tpu.dma_semaphore, #tpu.memory_space<semaphore_mem>>
    %93 = tpu.memref_squeeze %92 : memref<1x!tpu.dma_semaphore, #tpu.memory_space<semaphore_mem>> -> memref<!tpu.dma_semaphore, #tpu.memory_space<semaphore_mem>>
    tpu.enqueue_dma source(%90 : memref<8x16xf32, #tpu.memory_space<vmem>>) target(%91 : memref<8x16xf32, #tpu.memory_space<any>>) target_semaphore(%93 : memref<!tpu.dma_semaphore, #tpu.memory_space<semaphore_mem>>)
    %c2_i32_57 = arith.constant 2 : i32
    %c2_i32_58 = arith.constant 2 : i32
    %c0_i32_59 = arith.constant 0 : i32
    %c0_i32_60 = arith.constant 0 : i32
    %94 = tpu.memref_slice %arg4[%c2_i32_57, %c0_i32_59, %c0_i32_60] : memref<4x8x16xf32, #tpu.memory_space<vmem>> -> memref<1x8x16xf32, #tpu.memory_space<vmem>>
    %95 = tpu.memref_squeeze %94 : memref<1x8x16xf32, #tpu.memory_space<vmem>> -> memref<8x16xf32, #tpu.memory_space<vmem>>
    %c0_i32_61 = arith.constant 0 : i32
    %96 = tpu.memref_slice %arg3[%81, %c0_i32_61] : memref<128x16xf32, #tpu.memory_space<any>> -> memref<8x16xf32, #tpu.memory_space<any>>
    %97 = tpu.memref_slice %arg5[%c2_i32_58] : memref<4x!tpu.dma_semaphore, #tpu.memory_space<semaphore_mem>> -> memref<1x!tpu.dma_semaphore, #tpu.memory_space<semaphore_mem>>
    %98 = tpu.memref_squeeze %97 : memref<1x!tpu.dma_semaphore, #tpu.memory_space<semaphore_mem>> -> memref<!tpu.dma_semaphore, #tpu.memory_space<semaphore_mem>>
    tpu.enqueue_dma source(%95 : memref<8x16xf32, #tpu.memory_space<vmem>>) target(%96 : memref<8x16xf32, #tpu.memory_space<any>>) target_semaphore(%98 : memref<!tpu.dma_semaphore, #tpu.memory_space<semaphore_mem>>)
    %c3_i32_62 = arith.constant 3 : i32
    %c3_i32_63 = arith.constant 3 : i32
    %c0_i32_64 = arith.constant 0 : i32
    %c0_i32_65 = arith.constant 0 : i32
    %99 = tpu.memref_slice %arg4[%c3_i32_62, %c0_i32_64, %c0_i32_65] : memref<4x8x16xf32, #tpu.memory_space<vmem>> -> memref<1x8x16xf32, #tpu.memory_space<vmem>>
    %100 = tpu.memref_squeeze %99 : memref<1x8x16xf32, #tpu.memory_space<vmem>> -> memref<8x16xf32, #tpu.memory_space<vmem>>
    %c0_i32_66 = arith.constant 0 : i32
    %101 = tpu.memref_slice %arg3[%83, %c0_i32_66] : memref<128x16xf32, #tpu.memory_space<any>> -> memref<8x16xf32, #tpu.memory_space<any>>
    %102 = tpu.memref_slice %arg5[%c3_i32_63] : memref<4x!tpu.dma_semaphore, #tpu.memory_space<semaphore_mem>> -> memref<1x!tpu.dma_semaphore, #tpu.memory_space<semaphore_mem>>
    %103 = tpu.memref_squeeze %102 : memref<1x!tpu.dma_semaphore, #tpu.memory_space<semaphore_mem>> -> memref<!tpu.dma_semaphore, #tpu.memory_space<semaphore_mem>>
    tpu.enqueue_dma source(%100 : memref<8x16xf32, #tpu.memory_space<vmem>>) target(%101 : memref<8x16xf32, #tpu.memory_space<any>>) target_semaphore(%103 : memref<!tpu.dma_semaphore, #tpu.memory_space<semaphore_mem>>)
    %c0_i32_67 = arith.constant 0 : i32
    %c0_i32_68 = arith.constant 0 : i32
    %c0_i32_69 = arith.constant 0 : i32
    %c0_i32_70 = arith.constant 0 : i32
    %104 = tpu.memref_slice %arg4[%c0_i32_67, %c0_i32_69, %c0_i32_70] : memref<4x8x16xf32, #tpu.memory_space<vmem>> -> memref<1x8x16xf32, #tpu.memory_space<vmem>>
    %105 = tpu.memref_squeeze %104 : memref<1x8x16xf32, #tpu.memory_space<vmem>> -> memref<8x16xf32, #tpu.memory_space<vmem>>
    %c0_i32_71 = arith.constant 0 : i32
    %106 = tpu.memref_slice %arg3[%77, %c0_i32_71] : memref<128x16xf32, #tpu.memory_space<any>> -> memref<8x16xf32, #tpu.memory_space<any>>
    %107 = tpu.memref_slice %arg5[%c0_i32_68] : memref<4x!tpu.dma_semaphore, #tpu.memory_space<semaphore_mem>> -> memref<1x!tpu.dma_semaphore, #tpu.memory_space<semaphore_mem>>
    %108 = tpu.memref_squeeze %107 : memref<1x!tpu.dma_semaphore, #tpu.memory_space<semaphore_mem>> -> memref<!tpu.dma_semaphore, #tpu.memory_space<semaphore_mem>>
    tpu.wait_dma2 semaphore(%108 : memref<!tpu.dma_semaphore, #tpu.memory_space<semaphore_mem>>) src(%105 : memref<8x16xf32, #tpu.memory_space<vmem>>) dst(%106 : memref<8x16xf32, #tpu.memory_space<any>>)
    %c1_i32_72 = arith.constant 1 : i32
    %c1_i32_73 = arith.constant 1 : i32
    %c0_i32_74 = arith.constant 0 : i32
    %c0_i32_75 = arith.constant 0 : i32
    %109 = tpu.memref_slice %arg4[%c1_i32_72, %c0_i32_74, %c0_i32_75] : memref<4x8x16xf32, #tpu.memory_space<vmem>> -> memref<1x8x16xf32, #tpu.memory_space<vmem>>
    %110 = tpu.memref_squeeze %109 : memref<1x8x16xf32, #tpu.memory_space<vmem>> -> memref<8x16xf32, #tpu.memory_space<vmem>>
    %c0_i32_76 = arith.constant 0 : i32
    %111 = tpu.memref_slice %arg3[%79, %c0_i32_76] : memref<128x16xf32, #tpu.memory_space<any>> -> memref<8x16xf32, #tpu.memory_space<any>>
    %112 = tpu.memref_slice %arg5[%c1_i32_73] : memref<4x!tpu.dma_semaphore, #tpu.memory_space<semaphore_mem>> -> memref<1x!tpu.dma_semaphore, #tpu.memory_space<semaphore_mem>>
    %113 = tpu.memref_squeeze %112 : memref<1x!tpu.dma_semaphore, #tpu.memory_space<semaphore_mem>> -> memref<!tpu.dma_semaphore, #tpu.memory_space<semaphore_mem>>
    tpu.wait_dma2 semaphore(%113 : memref<!tpu.dma_semaphore, #tpu.memory_space<semaphore_mem>>) src(%110 : memref<8x16xf32, #tpu.memory_space<vmem>>) dst(%111 : memref<8x16xf32, #tpu.memory_space<any>>)
    %c2_i32_77 = arith.constant 2 : i32
    %c2_i32_78 = arith.constant 2 : i32
    %c0_i32_79 = arith.constant 0 : i32
    %c0_i32_80 = arith.constant 0 : i32
    %114 = tpu.memref_slice %arg4[%c2_i32_77, %c0_i32_79, %c0_i32_80] : memref<4x8x16xf32, #tpu.memory_space<vmem>> -> memref<1x8x16xf32, #tpu.memory_space<vmem>>
    %115 = tpu.memref_squeeze %114 : memref<1x8x16xf32, #tpu.memory_space<vmem>> -> memref<8x16xf32, #tpu.memory_space<vmem>>
    %c0_i32_81 = arith.constant 0 : i32
    %116 = tpu.memref_slice %arg3[%81, %c0_i32_81] : memref<128x16xf32, #tpu.memory_space<any>> -> memref<8x16xf32, #tpu.memory_space<any>>
    %117 = tpu.memref_slice %arg5[%c2_i32_78] : memref<4x!tpu.dma_semaphore, #tpu.memory_space<semaphore_mem>> -> memref<1x!tpu.dma_semaphore, #tpu.memory_space<semaphore_mem>>
    %118 = tpu.memref_squeeze %117 : memref<1x!tpu.dma_semaphore, #tpu.memory_space<semaphore_mem>> -> memref<!tpu.dma_semaphore, #tpu.memory_space<semaphore_mem>>
    tpu.wait_dma2 semaphore(%118 : memref<!tpu.dma_semaphore, #tpu.memory_space<semaphore_mem>>) src(%115 : memref<8x16xf32, #tpu.memory_space<vmem>>) dst(%116 : memref<8x16xf32, #tpu.memory_space<any>>)
    %c3_i32_82 = arith.constant 3 : i32
    %c3_i32_83 = arith.constant 3 : i32
    %c0_i32_84 = arith.constant 0 : i32
    %c0_i32_85 = arith.constant 0 : i32
    %119 = tpu.memref_slice %arg4[%c3_i32_82, %c0_i32_84, %c0_i32_85] : memref<4x8x16xf32, #tpu.memory_space<vmem>> -> memref<1x8x16xf32, #tpu.memory_space<vmem>>
    %120 = tpu.memref_squeeze %119 : memref<1x8x16xf32, #tpu.memory_space<vmem>> -> memref<8x16xf32, #tpu.memory_space<vmem>>
    %c0_i32_86 = arith.constant 0 : i32
    %121 = tpu.memref_slice %arg3[%83, %c0_i32_86] : memref<128x16xf32, #tpu.memory_space<any>> -> memref<8x16xf32, #tpu.memory_space<any>>
    %122 = tpu.memref_slice %arg5[%c3_i32_83] : memref<4x!tpu.dma_semaphore, #tpu.memory_space<semaphore_mem>> -> memref<1x!tpu.dma_semaphore, #tpu.memory_space<semaphore_mem>>
    %123 = tpu.memref_squeeze %122 : memref<1x!tpu.dma_semaphore, #tpu.memory_space<semaphore_mem>> -> memref<!tpu.dma_semaphore, #tpu.memory_space<semaphore_mem>>
    tpu.wait_dma2 semaphore(%123 : memref<!tpu.dma_semaphore, #tpu.memory_space<semaphore_mem>>) src(%120 : memref<8x16xf32, #tpu.memory_space<vmem>>) dst(%121 : memref<8x16xf32, #tpu.memory_space<any>>)
    return
  }
  func.func @transform_1(%arg0: i32) -> (i32, i32) {
    %c0_i32 = arith.constant 0 : i32
    %c0_i32_0 = arith.constant 0 : i32
    %c0_i32_1 = arith.constant 0 : i32
    return %c0_i32, %c0_i32_0 : i32, i32
  }
}

module attributes {stable_mosaic.version = 11 : i64} {
  func.func @_cutout_stream_kernel(%arg0: i32, %arg1: i32, %arg2: memref<2x4xi32, #tpu.memory_space<vmem>>, %arg3: memref<1x512xi32, #tpu.memory_space<vmem>>, %arg4: memref<2x512xf32, #tpu.memory_space<vmem>>, %arg5: memref<2x512xf32, #tpu.memory_space<vmem>>) attributes {dimension_semantics = [#tpu.dimension_semantics<parallel>, #tpu.dimension_semantics<parallel>], iteration_bounds = array<i64: 1, 2>, scalar_prefetch = 0 : i64, scratch_operands = 0 : i64, tpu.core_type = #tpu.core_type<tc>, window_params = [{transform_indices = @transform_0, window_bounds = array<i64: 2, 4>}, {transform_indices = @transform_1, window_bounds = array<i64: 1, 512>}, {transform_indices = @transform_2, window_bounds = array<i64: 2, 512>}, {transform_indices = @transform_3, window_bounds = array<i64: 2, 512>}]} {
    %c0 = arith.constant 0 : index
    %c0_0 = arith.constant 0 : index
    %0 = vector.load %arg2[%c0, %c0_0] : memref<2x4xi32, #tpu.memory_space<vmem>>, vector<2x4xi32>
    %1 = vector.extract_strided_slice %0 {offsets = [0, 0], sizes = [2, 1], strides = [1, 1]} : vector<2x4xi32> to vector<2x1xi32>
    %2 = vector.extract_strided_slice %0 {offsets = [0, 1], sizes = [2, 1], strides = [1, 1]} : vector<2x4xi32> to vector<2x1xi32>
    %3 = vector.extract_strided_slice %0 {offsets = [0, 2], sizes = [2, 1], strides = [1, 1]} : vector<2x4xi32> to vector<2x1xi32>
    %4 = vector.extract_strided_slice %0 {offsets = [0, 3], sizes = [2, 1], strides = [1, 1]} : vector<2x4xi32> to vector<2x1xi32>
    %c0_1 = arith.constant 0 : index
    %c0_2 = arith.constant 0 : index
    %5 = vector.load %arg3[%c0_1, %c0_2] : memref<1x512xi32, #tpu.memory_space<vmem>>, vector<1x512xi32>
    %c16_i32 = arith.constant 16 : i32
    %6 = vector.broadcast %c16_i32 : i32 to vector<1x512xi32>
    %7 = arith.shrsi %5, %6 : vector<1x512xi32>
    %c65535_i32 = arith.constant 65535 : i32
    %8 = vector.broadcast %c65535_i32 : i32 to vector<1x512xi32>
    %9 = arith.andi %5, %8 : vector<1x512xi32>
    %10 = vector.broadcast %7 : vector<1x512xi32> to vector<2x512xi32>
    %11 = vector.broadcast %1 : vector<2x1xi32> to vector<2x512xi32>
    %12 = arith.subi %10, %11 : vector<2x512xi32>
    %13 = vector.broadcast %2 : vector<2x1xi32> to vector<2x512xi32>
    %14 = arith.cmpi ult, %12, %13 : vector<2x512xi32>
    %15 = vector.broadcast %9 : vector<1x512xi32> to vector<2x512xi32>
    %16 = vector.broadcast %3 : vector<2x1xi32> to vector<2x512xi32>
    %17 = arith.subi %15, %16 : vector<2x512xi32>
    %18 = vector.broadcast %4 : vector<2x1xi32> to vector<2x512xi32>
    %19 = arith.cmpi ult, %17, %18 : vector<2x512xi32>
    %20 = arith.andi %14, %19 : vector<2x512xi1>
    %c0_3 = arith.constant 0 : index
    %c0_4 = arith.constant 0 : index
    %21 = vector.load %arg4[%c0_3, %c0_4] : memref<2x512xf32, #tpu.memory_space<vmem>>, vector<2x512xf32>
    %cst = arith.constant 0.000000e+00 : f32
    %22 = vector.broadcast %cst : f32 to vector<2x512xf32>
    %23 = arith.select %20, %22, %21 : vector<2x512xi1>, vector<2x512xf32>
    %c0_5 = arith.constant 0 : index
    %c0_6 = arith.constant 0 : index
    %24 = vector.load %arg5[%c0_5, %c0_6] : memref<2x512xf32, #tpu.memory_space<vmem>>, vector<2x512xf32>
    tpu.vector_store %arg5[%c0_5, %c0_6], %23 {strides = array<i32>} : memref<2x512xf32, #tpu.memory_space<vmem>>, vector<2x512xf32>,
    return
  }
  func.func @transform_0(%arg0: i32, %arg1: i32) -> (i32, i32) {
    %c0_i32 = arith.constant 0 : i32
    %c0_i32_0 = arith.constant 0 : i32
    return %arg0, %c0_i32 : i32, i32
  }
  func.func @transform_1(%arg0: i32, %arg1: i32) -> (i32, i32) {
    %c0_i32 = arith.constant 0 : i32
    %c0_i32_0 = arith.constant 0 : i32
    return %c0_i32, %arg1 : i32, i32
  }
  func.func @transform_2(%arg0: i32, %arg1: i32) -> (i32, i32) {
    %c0_i32 = arith.constant 0 : i32
    return %arg0, %arg1 : i32, i32
  }
  func.func @transform_3(%arg0: i32, %arg1: i32) -> (i32, i32) {
    %c0_i32 = arith.constant 0 : i32
    return %arg0, %arg1 : i32, i32
  }
}

</mosaic_0001>

<bundles_post_ra>
// kernel: tpu_custom_call.1
= control target key start
LH: loop header
LB: loop body
LE: loop exit
PB: predicated region body
PF: predicated region fallthrough
CT: control target
= control target key end

     0   :  { %8 = vsyncpa [#allocation3], 0  ;;  %s1020_s0 = inlined_call_operand.hbm [shape: s32[2,4], index: 0, kind: input, shape index: {}]   ;;  %s1021_s1 = inlined_call_operand.hbm [shape: s32[1,1024], index: 1, kind: input, shape index: {}]   ;;  %s1022_s2 = inlined_call_operand.hbm [shape: f32[2,1024], index: 2, kind: input, shape index: {}]   ;;  %s1023_s3 = inlined_call_operand.hbm [shape: f32[2,1024], index: 3, kind: output, shape index: {}]  }
   0x1   :  { %9 = vsyncpa [#allocation6], 0 }
   0x2   :  { %11 = vsyncpa [#allocation6 + $0x1], 0 }
   0x3   :  { %12 = vsyncpa [#allocation4], 0 }
   0x4   :  { %14 = vsyncpa [#allocation4 + $0x1], 0  ;;  %s823_s12 = smov 0   ;;  %s825_s13 = smov 0  }
   0x5   :  { %s827_s14 = smov 0   ;;  %s829_s15 = smov 0  }
   0x6   :  { %s831_s16 = smov 0   ;;  %s833_s17 = smov 0  }
   0x7 LB: > { %s29_s18 = sadd.s32 1, %s792_s16  ;;  %s65_s19 = sadd.s32 1, %s784_s14  ;;  %s796_s17 = sphi %s833_s17, %s20_s17   ;;  %s792_s16 = sphi %s831_s16, %s1042_s16   ;;  %s788_s15 = sphi %s829_s15, %s1041_s15   ;;  %s784_s14 = sphi %s827_s14, %s1040_s14   ;;  %s780_s13 = sphi %s825_s13, %s1039_s13   ;;  %s776_s12 = sphi %s823_s12, %s1038_s12  }
   0x8   : > { %p30_p0 = scmp.ge.s32.totalorder %s29_s18, 2  ;;  %p72_p1 = scmp.ne.s32.totalorder %s784_s14, %s780_s13 }
   0x9   : > { %p73_p2 = scmp.eq.s32.totalorder %s796_s17, 0  ;;  %p499_p3 = scmp.ge.s32.totalorder %s796_s17, 2 }
   0xa   : > { %s1044_s18 = smov (%p30_p0, %s29_s18), 0  ;;  %p559_p5 = scmp.lt.s32.totalorder %s796_s17, 2 }
   0xb   : > { %p864_p4 = por %p73_p2, %p72_p1  ;;  %s62_s21 = ssub.s32 %s792_s16, %s1044_s18 }
   0xc   : > { %s172_s22 = sand.u32 1, %s796_s17   ;;  %p63_p6 = scmp.eq.s32.totalorder %s62_s21, 0 }
   0xd   : > { %s174_s23 = sand.u32 1, %s784_s14   ;;  %s501_s24 = sshll.u32 %s792_s16, 2 }
   0xe   : > { %s875_s25 = scalar_select %p63_p6, %s784_s14, %s65_s19  }
   0xf   : > { %s500_s26 = sshll.u32 %s174_s23, 2  ;;  %s180_s29 = scalar_lea.hbm %s1021_s1, %s501_s24 }
  0x10   : > { %s182_s30 = sshll.u32 %s180_s29, 4  ;;  %s176_s4 = scalar_lea.vmem [#allocation5], %s500_s26  ;;  %s183_s30 = int_to_ptr.hbm [resolvable:$true] %s182_s30 }
  0x11   : > { %s184_s5 = sshll.u32 %s176_s4, 4  ;;  %p884_p7 = pnand %p559_p5, %p864_p4  ;;  %s185_s5 = int_to_ptr.vmem [resolvable:$true] %s184_s5 }
  0x12   : > { %s502_s7 = sshll.u32 %s174_s23, 3  ;;  %s888_s8 = scalar_lea.sflag [#allocation6], %s172_s22 }
  0x13   : > { %550 = dma.hbm_to_vmem [thread:$0]  (!%p884_p7), %s183_s30, 64, %s185_s5, %s888_s8  }
  0x14   : > { %s894_s9 = sadd.s32 4294967295, %s796_s17   ;;  %s496_s10 = sadd.s32 4294967294, %s796_s17  }
  0x15   : > { %p78_p8 = scmp.ne.s32.totalorder %s780_s13, %s776_s12  ;;  %p79_p9 = scmp.eq.s32.totalorder %s894_s9, 0 }
  0x16   : > { %p132_p10 = scmp.eq.s32.totalorder %s894_s9, 1  ;;  %p138_p11 = scmp.eq.s32.totalorder %s496_s10, 1 }
  0x17   : > { %p903_p12 = por %p79_p9, %p78_p8  ;;  %p497_p13 = scmp.ge.s32.totalorder %s796_s17, 1 }
  0x18   : > { %p911_p0 = por %p132_p10, %p72_p1  ;;  %p915_p2 = por %p138_p11, %p78_p8 }
  0x19   : > { %p145_p4 = scmp.lt.s32.totalorder %s796_s17, 3  ;;  %s159_s23 = sshll.u32 %s1020_s0, 4  ;;  %s160_s23 = int_to_ptr.hbm [resolvable:$true] %s159_s23 }
  0x1a   : > { %s798_s26 = smov [#allocation2]   ;;  %s531_s28 = sshll.u32 %s792_s16, 3 }
  0x1b   : > { %p923_p5 = pnand %p497_p13, %p145_p4  ;;  %s161_s27 = sshll.u32 %s798_s26, 4  ;;  %s162_s27 = int_to_ptr.vmem [resolvable:$true] %s161_s27 }
  0x1c   : > { %s195_s29 = scalar_lea.vmem [#allocation7], %s502_s7  ;;  %s202_s10 = scalar_lea.hbm %s1022_s2, %s531_s28 }
  0x1d   : > { %p543_p1 = pneg %p923_p5  ;;  %s206_s30 = sshll.u32 %s195_s29, 4  ;;  %s207_s30 = int_to_ptr.vmem [resolvable:$true] %s206_s30 }
  0x1e   : > { %s204_s21 = sshll.u32 %s202_s10, 4  ;;  %215 = sbr.rel (%p923_p5) target bundleno = 183 (0xb7), region = 32  ;;  %s205_s21 = int_to_ptr.hbm [resolvable:$true] %s204_s21 }
  0x1f   : > { %p544_p6 = pnand %p543_p1, %p79_p9 }
  0x20   : > { %553 = dma.hbm_to_vmem [thread:$0]  (!%p884_p7), %s205_s21, 128, %s207_s30, %s888_s8  }
  0x21   : > { %546 = dma.hbm_to_vmem [thread:$0]  (!%p544_p6), %s160_s23, 32, %s162_s27, [#allocation3]  }
  0x23   : > { %763 = dma.done.wait (%p79_p9), [#allocation3], 32  }
  0x24   : > { %765 = vsyncadd (%p79_p9), [#allocation3], 4294967264  ;;  %s222_s7 = sand.u32 1, %s894_s9   ;;  %s946_s22 = sand.u32 1, %s780_s13  }
  0x25   : > { %s507_s26 = sshll.u32 %s946_s22, 2  ;;  %s223_s23 = scalar_lea.sflag [#allocation6], %s222_s7 }
  0x26   : > { %s226_s6 = scalar_lea.vmem [#allocation5], %s507_s26 }
  0x27   : > { %767 = dma.done.wait (%p903_p12), %s223_s23, 192  }
  0x28   : > { %769 = vsyncadd (%p903_p12), %s223_s23, 4294967104  ;;  %v799_v0 = vmov 0   ;;  %v800_v1 = vmov 1   ;;  %v268_v2 = vld [vmem:[#allocation2] sm:$0x3]  ;;  %v801_v3 = vmov 2  }
  0x29   : > { %615 = vset.pattern.permute.xlu0 %v799_v0  ;;  %617 = vset.pattern.permute.xlu1 %v800_v1  ;;  %v802_v4 = vmov 3   ;;  %s508_s8 = sshll.u32 %s946_s22, 3  ;;  %v269_v6 = vld [vmem:[%s226_s6] sm:$0xf]  ;;  %s532_s11 = sshll.u32 %s788_s15, 3  ;;  %vm350_vm11 = vcmask 1041408  }
  0x2a   : > { %277 = vperm.xlu0 %615, %v268_v2   ;;  %284 = vperm.xlu1 %617, %v268_v2   ;;  %s236_s9 = scalar_lea.vmem [#allocation7], %s508_s8  ;;  %v270_v7 = vshra.s32 %v269_v6, 16  ;;  %v271_v11 = vand.u32 65535, %v269_v6  ;;  %s372_s27 = scalar_lea.hbm %s1023_s3, %s532_s11  ;;  %vm352_vm13 = vcmask 1045508   ;;  %vm354_vm14 = vcmask 1043456  }
  0x2b   : > { %v328_v5 = vld [vmem:[%s236_s9] sm:$0xff]  ;;  %s264_s28 = scalar_lea.vmem [#allocation8], %s508_s8  ;;  %s376_s30 = sshll.u32 %s372_s27, 4  ;;  %s377_s30 = int_to_ptr.hbm [resolvable:$true] %s376_s30 }
  0x2c   : > { %330 = vst [vmem:[#allocation1] ss:$4 sm:$0xff] %v328_v5  ;;  %v272_v10 = vperm.slane %v270_v7, 0  ;;  %v273_v12 = vperm.slane %v270_v7, 1  ;;  %v274_v13 = vperm.slane %v270_v7, 2  ;;  %v275_v14 = vperm.slane %v270_v7, 3 }
  0x2d   : > { %v298_v16 = vperm.slane %v271_v11, 0  ;;  %v299_v17 = vperm.slane %v271_v11, 1  ;;  %v300_v18 = vperm.slane %v271_v11, 2  ;;  %v301_v19 = vperm.slane %v271_v11, 3  ;;  %s374_s29 = sshll.u32 %s264_s28, 4  ;;  %s359_s4 = scalar_lea.sflag [#allocation4], %s946_s22  ;;  %s375_s29 = int_to_ptr.vmem [resolvable:$true] %s374_s29 }
  0x2e   : > { %s724_s5 = sshra.s32 %s377_s30, 4  ;;  %s730_s26 = scalar_lea.hbm %s1023_s3, 16  ;;  %s725_s5 = int_to_ptr.hbm [resolvable:$true] %s724_s5 }
  0x2f   : > { %s726_s10 = scalar_lea.hbm %s725_s5, 8  ;;  %p731_p10 = scmp.lt.s32.totalorder %s725_s5, %s1023_s3 }
  0x30   : > { %p727_p7 = scmp.ne.s32.totalorder %s725_s5, %s726_s10  ;;  %p732_p11 = scmp.lt.s32.totalorder %s730_s26, %s726_s10 }
  0x32   : > { %616 = vset.pattern.permute.xlu0 %v801_v3  ;;  %618 = vset.pattern.permute.xlu1 %v802_v4  ;;  %p728_p8 = pnand %p727_p7, %p911_p0  ;;  %p733_p12 = por %p732_p11, %p731_p10 }
  0x33   : > { %303 = vperm.xlu0 %616, %v268_v2   ;;  %310 = vperm.xlu1 %618, %v268_v2   ;;  %v332_v42 = vld.sshfl [vmem:[#allocation1 + $0x8] sm:$0xff pattern:$0x73625140]  ;;  %v333_v44 = vld.sshfl [vmem:[#allocation1 + $0x10] sm:$0xff pattern:$0x73625140] }
  0x34   : > { %v331_v45 = vld.sshfl [vmem:[#allocation1] sm:$0xff pattern:$0x73625140]  ;;  %v334_v46 = vld.sshfl [vmem:[#allocation1 + $0x18] sm:$0xff pattern:$0x73625140]  ;;  %p729_p9 = pneg %p728_p8 }
  0x36   : > { %p734_p13 = pnand %p733_p12, %p729_p9 }
  0x3b   : > { %619 = vset.pattern.permute.xlu0 %v802_v4 }
  0x9c   : > { %v278_v8 = vpop.permute.xlu0 %277  ;;  %v285_v9 = vpop.permute.xlu1 %284 }
  0x9d   : > { %v279_v15 = vsub.s32 %v272_v10, %v278_v8  ;;  %v280_v20 = vsub.s32 %v273_v12, %v278_v8  ;;  %v281_v21 = vsub.s32 %v274_v13, %v278_v8  ;;  %v282_v22 = vsub.s32 %v275_v14, %v278_v8 }
  0x9e   : > { %v511_v24 = vxor.u32 2147483648, %v285_v9 }
  0x9f   : > { %v510_v23 = vxor.u32 2147483648, %v279_v15  ;;  %v512_v31 = vxor.u32 2147483648, %v280_v20  ;;  %v514_v32 = vxor.u32 2147483648, %v281_v21  ;;  %v516_v38 = vxor.u32 2147483648, %v282_v22 }
  0xa1   : > { %vm957_vm0 = vcmp.lt.s32.totalorder %v510_v23, %v511_v24  ;;  %vm291_vm4 = vcmp.lt.s32.totalorder %v512_v31, %v511_v24  ;;  %vm294_vm7 = vcmp.lt.s32.totalorder %v514_v32, %v511_v24  ;;  %vm297_vm9 = vcmp.lt.s32.totalorder %v516_v38, %v511_v24 }
  0xa5   : > { %v304_v25 = vpop.permute.xlu0 %303  ;;  %v311_v26 = vpop.permute.xlu1 %310 }
  0xa6   : > { %v305_v27 = vsub.s32 %v298_v16, %v304_v25  ;;  %v306_v28 = vsub.s32 %v299_v17, %v304_v25  ;;  %v307_v29 = vsub.s32 %v300_v18, %v304_v25  ;;  %v308_v30 = vsub.s32 %v301_v19, %v304_v25 }
  0xa7   : > { %v519_v33 = vxor.u32 2147483648, %v311_v26 }
  0xa8   : > { %v518_v34 = vxor.u32 2147483648, %v305_v27  ;;  %v520_v35 = vxor.u32 2147483648, %v306_v28  ;;  %v522_v36 = vxor.u32 2147483648, %v307_v29  ;;  %v524_v37 = vxor.u32 2147483648, %v308_v30 }
  0xaa   : > { %vm961_vm1 = vcmp.lt.s32.totalorder %v518_v34, %v519_v33  ;;  %vm317_vm2 = vcmp.lt.s32.totalorder %v520_v35, %v519_v33  ;;  %vm965_vm3 = vcmp.lt.s32.totalorder %v522_v36, %v519_v33  ;;  %vm969_vm5 = vcmp.lt.s32.totalorder %v524_v37, %v519_v33 }
  0xab   : > { %vm324_vm6 = vmand %vm957_vm0, %vm961_vm1 }
  0xac   : > { %vm325_vm8 = vmand %vm291_vm4, %vm317_vm2  ;;  %v339_v50 = vsel %vm324_vm6, 0.0, %v331_v45 }
  0xad   : > { %vm326_vm10 = vmand %vm294_vm7, %vm965_vm3  ;;  %v340_v47 = vsel %vm325_vm8, 0.0, %v332_v42 }
  0xae   : > { %vm327_vm12 = vmand %vm297_vm9, %vm969_vm5  ;;  %v341_v48 = vsel %vm326_vm10, 0.0, %v333_v44  ;;  %v347_v49 = vrot.slane %v340_v47, 6 }
  0xaf   : > { %v342_v51 = vsel %vm327_vm12, 0.0, %v334_v46  ;;  %v348_v52 = vrot.slane %v341_v48, 4 }
  0xb0   : > { %v349_v53 = vrot.slane %v342_v51, 2  ;;  %v351_v54 = vsel %vm350_vm11, %v339_v50, %v347_v49 }
  0xb2   : > { %v353_v55 = vsel %vm352_vm13, %v348_v52, %v349_v53 }
  0xb3   : > { %v355_v56 = vsel %vm354_vm14, %v351_v54, %v353_v55 }
  0xb4   : > { %357 = vst [vmem:[%s264_s28] sm:$0xff] %v355_v56 }
  0xb5   : > { %737 = shalt.err (!%p734_p13)
}
  0xb6   : > { %541 = dma.vmem_to_hbm [thread:$0]  (%p911_p0), %s375_s29, 128, %s377_s30, %s359_s4  }
  0xb7 PF: > { %s388_s22 = sand.u32 1, %s776_s12   ;;  %p555_p4 = pnand %p499_p3, %p915_p2 }
  0xb8   : > { %s389_s8 = scalar_lea.sflag [#allocation4], %s388_s22 }
  0xb9   : > { %p556_p5 = pneg %p555_p4 }
  0xbb   : > { %771 = dma.done.wait (%p556_p5), %s389_s8, 128  }
  0xbc   : > { %773 = vsyncadd (%p556_p5), %s389_s8, 4294967168  ;;  %s20_s17 = sadd.s32 1, %s796_s17   ;;  %s1038_s12 = smov %s780_s13 }
  0xbd   : > { %p17_p1 = scmp.ge.s32.totalorder %s20_s17, 4   ;;  %s1039_s13 = smov %s784_s14 }
  0xbe   : > { %s1040_s14 = smov %s875_s25  ;;  %s1041_s15 = smov %s792_s16 }
  0xbf   : > { %s1042_s16 = smov %s1044_s18  ;;  %19 = sbr.rel (!%p17_p1) target bundleno = 7 (0x7), region = 94 }
  0xc4   :  { %395 = vsyncpa [#allocation3], 1 }
  0xc5   :  { %397 = vsyncpa [#allocation3 + $0x1], 1 }
  0xc6   :  { %398 = vsyncpa [#allocation6], 1 }
  0xc7   :  { %400 = vsyncpa [#allocation6 + $0x1], 1 }
  0xc8   :  { %401 = vsyncpa [#allocation4], 1 }
  0xc9   :  { %403 = vsyncpa [#allocation4 + $0x1], 1 }

</bundles_post_ra>
